<compile_context>
chip_gen: v5e
topology: v5e:2x2
jax: 0.10.0
libtpu: 0.0.40
codegen_flags: <defaults>
</compile_context>

<pallas_src>
import functools

import jax
import jax.numpy as jnp
import numpy as np
from jax import lax
from jax.experimental import pallas as pl
from jax.experimental.pallas import tpu as pltpu


def _round_up(x, m):
    return ((x + m - 1) // m) * m


def _is_v7x():
    """True only on 2-TensorCore v7x parts; safe False fallback elsewhere."""
    try:
        kind = jax.devices()[0].device_kind.lower()
    except Exception:
        return False
    return ("v7" in kind) or ("7x" in kind)


def _sublane_partial_sum(x):
    """(rows, D) -> (8, D) partial sums using 8-aligned slices + VALU adds.

    The final 8->1 sublane reduction (and the lane reduction) happens once in
    the JAX epilogue, so the kernel never does a per-step cross-lane reduce
    or a sub-(8,128) masked accumulator store.
    """
    rows, d = x.shape
    if rows % 8 != 0:
        # Tiny-batch fallback (rows < 8): place the row-sum in sublane 0.
        s = jnp.sum(x, axis=0, keepdims=True)                     # (1, D)
        sub = lax.broadcasted_iota(jnp.int32, (8, 1), 0)
        return jnp.where(sub == 0, s, 0.0)                        # (8, D)
    parts = [x[j * 8:(j + 1) * 8, :] for j in range(rows // 8)]
    while len(parts) > 1:
        merged = [parts[2 * k] + parts[2 * k + 1] for k in range(len(parts) // 2)]
        if len(parts) % 2:
            merged.append(parts[-1])
        parts = merged
    return parts[0]


def _byol_kernel(stu_a_ref, stu_b_ref, tea_a_ref, tea_b_ref,
                 cos_ref, stu_sum_ref, stu_sq_ref, tea_sum_ref, tea_sq_ref,
                 *, symmetric, tm, bpc, half, needs_mask):
    c = pl.program_id(0)     # TensorCore split (size 1 on single-TC chips)
    i = pl.program_id(1)     # streaming reduction over row blocks

    @pl.when(i == 0)
    def _init():
        cos_ref[...] = jnp.zeros_like(cos_ref)
        stu_sum_ref[...] = jnp.zeros_like(stu_sum_ref)
        stu_sq_ref[...] = jnp.zeros_like(stu_sq_ref)
        tea_sum_ref[...] = jnp.zeros_like(tea_sum_ref)
        tea_sq_ref[...] = jnp.zeros_like(tea_sq_ref)

    stu_a = stu_a_ref[...].astype(jnp.float32)   # (tm, D) student, chunk 0
    stu_b = stu_b_ref[...].astype(jnp.float32)   # (tm, D) student, chunk 1
    tea_a = tea_a_ref[...].astype(jnp.float32)   # (tm, D) teacher, chunk 0
    tea_b = tea_b_ref[...].astype(jnp.float32)   # (tm, D) teacher, chunk 1

    if needs_mask:
        # Zero out rows of partial (or fully out-of-range) blocks before any
        # arithmetic; zero rows L2-normalize to zero vectors and contribute
        # nothing to any accumulator.
        g = c * bpc + i                                  # global block index
        limit = half - g * tm                            # valid rows here
        row = lax.broadcasted_iota(jnp.int32, (tm, 1), 0)
        valid = row < limit
        stu_a = jnp.where(valid, stu_a, 0.0)
        stu_b = jnp.where(valid, stu_b, 0.0)
        tea_a = jnp.where(valid, tea_a, 0.0)
        tea_b = jnp.where(valid, tea_b, 0.0)

    # Squared row norms, computed once and reused (CSE).
    ss_sa = jnp.sum(stu_a * stu_a, axis=-1, keepdims=True)
    ss_sb = jnp.sum(stu_b * stu_b, axis=-1, keepdims=True)
    ss_ta = jnp.sum(tea_a * tea_a, axis=-1, keepdims=True)
    ss_tb = jnp.sum(tea_b * tea_b, axis=-1, keepdims=True)

    # F.normalize(x, dim=-1): x / max(||x||, 1e-12) == x * rsqrt(max(ss, 1e-24))
    eps = jnp.float32(1e-24)
    sa_n = stu_a * lax.rsqrt(jnp.maximum(ss_sa, eps))
    sb_n = stu_b * lax.rsqrt(jnp.maximum(ss_sb, eps))
    ta_n = tea_a * lax.rsqrt(jnp.maximum(ss_ta, eps))
    tb_n = tea_b * lax.rsqrt(jnp.maximum(ss_tb, eps))

    if symmetric:
        # Cross-chunk pairing: cos(tea0, stu1) + cos(tea1, stu0).
        cos_part = ta_n * sb_n + tb_n * sa_n
    else:
        # Same-row pairing: cos(tea, stu), reusing the normalized rows
        # (identical to F.cosine_similarity for every non-zero row).
        cos_part = ta_n * sa_n + tb_n * sb_n

    # TODO(synk): optionally push these axis-0 sums through the MXU
    # (ones(8, tm) @ X) on v7x if profiles show the VALU slot saturating.
    cos_ref[...] += _sublane_partial_sum(cos_part)
    stu_sum_ref[...] += _sublane_partial_sum(sa_n + sb_n)
    stu_sq_ref[...] += _sublane_partial_sum(sa_n * sa_n + sb_n * sb_n)
    tea_sum_ref[...] += _sublane_partial_sum(ta_n + tb_n)
    tea_sq_ref[...] += _sublane_partial_sum(ta_n * ta_n + tb_n * tb_n)


@functools.partial(jax.jit, static_argnames=("symmetric", "tm"))
def byol_loss(student, teacher, symmetric=True, tm=512):
    """Returns (total_loss_frm, std_frm_stu, std_frm_tea) like ByolLoss.forward.

    Pass activations in their native dtype (e.g. bf16); the kernel upcasts
    in-register, so the HBM stream stays narrow.
    """
    N, D = student.shape
    assert teacher.shape == (N, D)
    if symmetric:
        assert N % 2 == 0, "symmetric ByolLoss requires an even batch (chunk(2))"
        n_even = N
    else:
        n_even = _round_up(N, 2)

    stu, tea = student, teacher
    if n_even != N:
        # Rare corner case (odd batch, symmetric=False): one zero row, which
        # normalizes to zero and contributes nothing.  The common case below
        # is copy-free.
        stu = jnp.pad(stu, ((0, n_even - N), (0, 0)))
        tea = jnp.pad(tea, ((0, n_even - N), (0, 0)))

    half = n_even // 2
    # Free (bitcast) view exposing the two torch.chunk(2) halves.
    stu2 = stu.reshape(2, half, D)
    tea2 = tea.reshape(2, half, D)

    is_v7x = _is_v7x()
    itemsize = jnp.dtype(student.dtype).itemsize

    # ---- Row tile + scoped-VMEM sizing (per chip) --------------------------
    # Per tile row: 4 double-buffered native-dtype input streams plus ~10 f32
    # temporaries (upcasts, normalized rows, products) the compiler may keep
    # in VMEM for large tiles.
    per_row_bytes = 4 * 2 * D * itemsize + 10 * D * 4
    vmem_cap = (40 << 20) if is_v7x else (96 << 20)
    tm_fit = max(8, ((vmem_cap - (4 << 20)) // per_row_bytes) // 8 * 8)

    if half >= 8:
        tm_eff = max(8, (min(tm, half, tm_fit) // 8) * 8)
    else:
        tm_eff = half                      # tiny batch: one full-chunk block

    n_blocks = pl.cdiv(half, tm_eff)
    num_cores = 2 if (is_v7x and n_blocks >= 2) else 1
    bpc = pl.cdiv(n_blocks, num_cores)                  # blocks per core
    needs_mask = (num_cores * bpc * tm_eff) != half

    vmem_need = (per_row_bytes * tm_eff                 # streamed tiles + temps
                 + 5 * 2 * 8 * D * 4                    # double-buffered accums
                 + (4 << 20))                           # headroom / scratch
    vmem_limit = int(min(vmem_cap, max(vmem_need, 8 << 20)))

    # ---- BlockSpecs ---------------------------------------------------------
    def chunk_map(chunk):
        def index_map(c, i):
            # Clamp so no DMA ever targets a block past the chunk; duplicated
            # blocks are fully zeroed by the in-kernel row mask.
            g = jnp.minimum(c * bpc + i, n_blocks - 1)
            return (chunk, g, 0)
        return index_map

    in_spec0 = pl.BlockSpec((None, tm_eff, D), chunk_map(0))
    in_spec1 = pl.BlockSpec((None, tm_eff, D), chunk_map(1))
    out_spec = pl.BlockSpec((8, D), lambda c, i: (c, 0))

    grid_spec = pltpu.PrefetchScalarGridSpec(
        num_scalar_prefetch=0,
        grid=(num_cores, bpc),
        in_specs=[in_spec0, in_spec1, in_spec0, in_spec1],
        out_specs=[out_spec] * 5,
    )
    out_shape = tuple(
        jax.ShapeDtypeStruct((num_cores * 8, D), jnp.float32) for _ in range(5))

    rows_total = 2 * num_cores * bpc * tm_eff
    cost = pl.CostEstimate(
        flops=int(14 * rows_total * D),
        transcendentals=int(2 * rows_total),
        bytes_accessed=int(2 * n_even * D * itemsize + 5 * num_cores * 8 * D * 4),
    )

    cos_acc, stu_sum, stu_sq, tea_sum, tea_sq = pl.pallas_call(
        functools.partial(_byol_kernel, symmetric=symmetric, tm=tm_eff,
                          bpc=bpc, half=half, needs_mask=needs_mask),
        out_shape=out_shape,
        grid_spec=grid_spec,
        compiler_params=pltpu.CompilerParams(
            dimension_semantics=("parallel", "arbitrary"),
            vmem_limit_bytes=vmem_limit,
        ),
        cost_estimate=cost,
    )(stu2, stu2, tea2, tea2)

    n = jnp.float32(N)

    # Epilogue: one sublane/core reduction + one lane reduction per output.
    # Symmetric:  (loss(t0,s1)+loss(t1,s0))/2 == 2 - 2*sum_cross/N
    # Simplified: 2 - 2*mean(cos(tea, stu))   == 2 - 2*sum_same/N
    total_loss = 2.0 - 2.0 * jnp.sum(cos_acc) / n

    def std_mean(s_acc, sq_acc):
        # compute_var on a single replica: var = zss/(n-1) - zs^2/(n*(n-1))
        zs = jnp.sum(s_acc, axis=0)
        zss = jnp.sum(sq_acc, axis=0)
        var = zss / (n - 1.0) - (zs * zs) / (n * (n - 1.0))
        return jnp.sqrt(var + 1e-6).mean()

    return total_loss, std_mean(stu_sum, stu_sq), std_mean(tea_sum, tea_sq)


def _reference(student, teacher, symmetric):
    """Pure-JAX transcription of ByolLoss.forward (single replica)."""
    student = student.astype(jnp.float32)
    teacher = teacher.astype(jnp.float32)

    def normalize(x):
        nrm = jnp.sqrt(jnp.sum(x * x, axis=-1, keepdims=True))
        return x / jnp.maximum(nrm, 1e-12)

    def compute_var(y):
        n = y.shape[0]
        zs = y.sum(axis=0)
        zss = (y ** 2).sum(axis=0)
        var = zss / (n - 1) - zs ** 2 / (n * (n - 1))
        return jnp.sqrt(var + 1e-6)

    std_stu = compute_var(normalize(student)).mean()
    std_tea = compute_var(normalize(teacher)).mean()

    if symmetric:
        s0, s1 = jnp.split(student, 2)
        t0, t1 = jnp.split(teacher, 2)

        def loss(q, v):
            qn, vn = normalize(q), normalize(v)
            return 2.0 - 2.0 * (qn * vn).sum(axis=-1).mean()

        total = (loss(t0, s1) + loss(t1, s0)) / 2.0
    else:
        num = (teacher * student).sum(axis=-1)
        den = jnp.maximum(
            jnp.sqrt((teacher ** 2).sum(-1)) * jnp.sqrt((student ** 2).sum(-1)),
            1e-8)
        total = 2.0 - 2.0 * (num / den).mean()
    return total, std_stu, std_tea


if __name__ == "__main__":
    key = jax.random.PRNGKey(0)
    configs = [
        (16, 32, True),    # clean tiles, no masking
        (16, 32, False),   # simplified cosine path
        (24, 40, True),    # exercises the partial-last-block row mask
        (13, 40, False),   # exercises odd-N pad + tiny-chunk fallback
    ]
    for (N, D, symmetric) in configs:
        k1, k2 = jax.random.split(jax.random.fold_in(key, 1000 * N + D))
        student = jax.random.normal(k1, (N, D), dtype=jnp.float32)
        teacher = jax.random.normal(k2, (N, D), dtype=jnp.float32)

        out = byol_loss(student, teacher, symmetric=symmetric)
        out = jax.block_until_ready(out)
        ref = _reference(student, teacher, symmetric)
        for got, want in zip(out, ref):
            np.testing.assert_allclose(np.asarray(got), np.asarray(want),
                                       rtol=2e-4, atol=2e-5)
    print("KERNEL_OK")
</pallas_src>

<mosaic_0001>
module attributes {stable_mosaic.version = 11 : i64} {
  func.func @_byol_kernel(%arg0: i32, %arg1: i32, %arg2: memref<1x8x32xf32, #tpu.memory_space<vmem>>, %arg3: memref<1x8x32xf32, #tpu.memory_space<vmem>>, %arg4: memref<1x8x32xf32, #tpu.memory_space<vmem>>, %arg5: memref<1x8x32xf32, #tpu.memory_space<vmem>>, %arg6: memref<8x32xf32, #tpu.memory_space<vmem>>, %arg7: memref<8x32xf32, #tpu.memory_space<vmem>>, %arg8: memref<8x32xf32, #tpu.memory_space<vmem>>, %arg9: memref<8x32xf32, #tpu.memory_space<vmem>>, %arg10: memref<8x32xf32, #tpu.memory_space<vmem>>) attributes {dimension_semantics = [#tpu.dimension_semantics<parallel>, #tpu.dimension_semantics<arbitrary>], iteration_bounds = array<i64: 1, 1>, scalar_prefetch = 0 : i64, scratch_operands = 0 : i64, tpu.core_type = #tpu.core_type<tc>, window_params = [{transform_indices = @transform_0, window_bounds = array<i64: 1, 8, 32>}, {transform_indices = @transform_1, window_bounds = array<i64: 1, 8, 32>}, {transform_indices = @transform_2, window_bounds = array<i64: 1, 8, 32>}, {transform_indices = @transform_3, window_bounds = array<i64: 1, 8, 32>}, {transform_indices = @transform_4, window_bounds = array<i64: 8, 32>}, {transform_indices = @transform_5, window_bounds = array<i64: 8, 32>}, {transform_indices = @transform_6, window_bounds = array<i64: 8, 32>}, {transform_indices = @transform_7, window_bounds = array<i64: 8, 32>}, {transform_indices = @transform_8, window_bounds = array<i64: 8, 32>}]} {
    %c0_i32 = arith.constant 0 : i32
    %0 = arith.cmpi eq, %arg1, %c0_i32 : i32
    %1 = arith.extui %0 : i1 to i32
    %c0_i32_0 = arith.constant 0 : i32
    %2 = arith.cmpi ne, %1, %c0_i32_0 : i32
    scf.if %2 {
      %cst_39 = arith.constant 0.000000e+00 : f32
      %69 = vector.broadcast %cst_39 : f32 to vector<8x32xf32>
      %c0_40 = arith.constant 0 : index
      %c0_41 = arith.constant 0 : index
      %70 = vector.load %arg6[%c0_40, %c0_41] : memref<8x32xf32, #tpu.memory_space<vmem>>, vector<8x32xf32>
      tpu.vector_store %arg6[%c0_40, %c0_41], %69 {strides = array<i32>} : memref<8x32xf32, #tpu.memory_space<vmem>>, vector<8x32xf32>,
      %cst_42 = arith.constant 0.000000e+00 : f32
      %71 = vector.broadcast %cst_42 : f32 to vector<8x32xf32>
      %c0_43 = arith.constant 0 : index
      %c0_44 = arith.constant 0 : index
      %72 = vector.load %arg7[%c0_43, %c0_44] : memref<8x32xf32, #tpu.memory_space<vmem>>, vector<8x32xf32>
      tpu.vector_store %arg7[%c0_43, %c0_44], %71 {strides = array<i32>} : memref<8x32xf32, #tpu.memory_space<vmem>>, vector<8x32xf32>,
      %cst_45 = arith.constant 0.000000e+00 : f32
      %73 = vector.broadcast %cst_45 : f32 to vector<8x32xf32>
      %c0_46 = arith.constant 0 : index
      %c0_47 = arith.constant 0 : index
      %74 = vector.load %arg8[%c0_46, %c0_47] : memref<8x32xf32, #tpu.memory_space<vmem>>, vector<8x32xf32>
      tpu.vector_store %arg8[%c0_46, %c0_47], %73 {strides = array<i32>} : memref<8x32xf32, #tpu.memory_space<vmem>>, vector<8x32xf32>,
      %cst_48 = arith.constant 0.000000e+00 : f32
      %75 = vector.broadcast %cst_48 : f32 to vector<8x32xf32>
      %c0_49 = arith.constant 0 : index
      %c0_50 = arith.constant 0 : index
      %76 = vector.load %arg9[%c0_49, %c0_50] : memref<8x32xf32, #tpu.memory_space<vmem>>, vector<8x32xf32>
      tpu.vector_store %arg9[%c0_49, %c0_50], %75 {strides = array<i32>} : memref<8x32xf32, #tpu.memory_space<vmem>>, vector<8x32xf32>,
      %cst_51 = arith.constant 0.000000e+00 : f32
      %77 = vector.broadcast %cst_51 : f32 to vector<8x32xf32>
      %c0_52 = arith.constant 0 : index
      %c0_53 = arith.constant 0 : index
      %78 = vector.load %arg10[%c0_52, %c0_53] : memref<8x32xf32, #tpu.memory_space<vmem>>, vector<8x32xf32>
      tpu.vector_store %arg10[%c0_52, %c0_53], %77 {strides = array<i32>} : memref<8x32xf32, #tpu.memory_space<vmem>>, vector<8x32xf32>,
    } else {
    }
    %c0 = arith.constant 0 : index
    %c0_1 = arith.constant 0 : index
    %c0_2 = arith.constant 0 : index
    %3 = vector.load %arg2[%c0, %c0_1, %c0_2] : memref<1x8x32xf32, #tpu.memory_space<vmem>>, vector<1x8x32xf32>
    %4 = vector.shape_cast %3 : vector<1x8x32xf32> to vector<8x32xf32>
    %c0_3 = arith.constant 0 : index
    %c0_4 = arith.constant 0 : index
    %c0_5 = arith.constant 0 : index
    %5 = vector.load %arg3[%c0_3, %c0_4, %c0_5] : memref<1x8x32xf32, #tpu.memory_space<vmem>>, vector<1x8x32xf32>
    %6 = vector.shape_cast %5 : vector<1x8x32xf32> to vector<8x32xf32>
    %c0_6 = arith.constant 0 : index
    %c0_7 = arith.constant 0 : index
    %c0_8 = arith.constant 0 : index
    %7 = vector.load %arg4[%c0_6, %c0_7, %c0_8] : memref<1x8x32xf32, #tpu.memory_space<vmem>>, vector<1x8x32xf32>
    %8 = vector.shape_cast %7 : vector<1x8x32xf32> to vector<8x32xf32>
    %c0_9 = arith.constant 0 : index
    %c0_10 = arith.constant 0 : index
    %c0_11 = arith.constant 0 : index
    %9 = vector.load %arg5[%c0_9, %c0_10, %c0_11] : memref<1x8x32xf32, #tpu.memory_space<vmem>>, vector<1x8x32xf32>
    %10 = vector.shape_cast %9 : vector<1x8x32xf32> to vector<8x32xf32>
    %11 = arith.mulf %4, %4 : vector<8x32xf32>
    %cst = arith.constant dense<0.000000e+00> : vector<8xf32>
    %12 = vector.multi_reduction <add>, %11, %cst [1] : vector<8x32xf32> to vector<8xf32>
    %13 = vector.shape_cast %12 : vector<8xf32> to vector<8x1xf32>
    %14 = arith.mulf %6, %6 : vector<8x32xf32>
    %cst_12 = arith.constant dense<0.000000e+00> : vector<8xf32>
    %15 = vector.multi_reduction <add>, %14, %cst_12 [1] : vector<8x32xf32> to vector<8xf32>
    %16 = vector.shape_cast %15 : vector<8xf32> to vector<8x1xf32>
    %17 = arith.mulf %8, %8 : vector<8x32xf32>
    %cst_13 = arith.constant dense<0.000000e+00> : vector<8xf32>
    %18 = vector.multi_reduction <add>, %17, %cst_13 [1] : vector<8x32xf32> to vector<8xf32>
    %19 = vector.shape_cast %18 : vector<8xf32> to vector<8x1xf32>
    %20 = arith.mulf %10, %10 : vector<8x32xf32>
    %cst_14 = arith.constant dense<0.000000e+00> : vector<8xf32>
    %21 = vector.multi_reduction <add>, %20, %cst_14 [1] : vector<8x32xf32> to vector<8xf32>
    %22 = vector.shape_cast %21 : vector<8xf32> to vector<8x1xf32>
    %cst_15 = arith.constant 1.000000e-24 : f32
    %23 = vector.broadcast %cst_15 : f32 to vector<8x1xf32>
    %24 = arith.maximumf %13, %23 : vector<8x1xf32>
    %25 = math.rsqrt %24 : vector<8x1xf32>
    %26 = vector.broadcast %25 : vector<8x1xf32> to vector<8x32xf32>
    %27 = arith.mulf %4, %26 : vector<8x32xf32>
    %cst_16 = arith.constant 1.000000e-24 : f32
    %28 = vector.broadcast %cst_16 : f32 to vector<8x1xf32>
    %29 = arith.maximumf %16, %28 : vector<8x1xf32>
    %30 = math.rsqrt %29 : vector<8x1xf32>
    %31 = vector.broadcast %30 : vector<8x1xf32> to vector<8x32xf32>
    %32 = arith.mulf %6, %31 : vector<8x32xf32>
    %cst_17 = arith.constant 1.000000e-24 : f32
    %33 = vector.broadcast %cst_17 : f32 to vector<8x1xf32>
    %34 = arith.maximumf %19, %33 : vector<8x1xf32>
    %35 = math.rsqrt %34 : vector<8x1xf32>
    %36 = vector.broadcast %35 : vector<8x1xf32> to vector<8x32xf32>
    %37 = arith.mulf %8, %36 : vector<8x32xf32>
    %cst_18 = arith.constant 1.000000e-24 : f32
    %38 = vector.broadcast %cst_18 : f32 to vector<8x1xf32>
    %39 = arith.maximumf %22, %38 : vector<8x1xf32>
    %40 = math.rsqrt %39 : vector<8x1xf32>
    %41 = vector.broadcast %40 : vector<8x1xf32> to vector<8x32xf32>
    %42 = arith.mulf %10, %41 : vector<8x32xf32>
    %43 = arith.mulf %37, %32 : vector<8x32xf32>
    %44 = arith.mulf %42, %27 : vector<8x32xf32>
    %45 = arith.addf %43, %44 : vector<8x32xf32>
    %c0_19 = arith.constant 0 : index
    %c0_20 = arith.constant 0 : index
    %46 = vector.load %arg6[%c0_19, %c0_20] : memref<8x32xf32, #tpu.memory_space<vmem>>, vector<8x32xf32>
    %47 = arith.addf %46, %45 : vector<8x32xf32>
    %c0_21 = arith.constant 0 : index
    %c0_22 = arith.constant 0 : index
    %48 = vector.load %arg6[%c0_21, %c0_22] : memref<8x32xf32, #tpu.memory_space<vmem>>, vector<8x32xf32>
    tpu.vector_store %arg6[%c0_21, %c0_22], %47 {strides = array<i32>} : memref<8x32xf32, #tpu.memory_space<vmem>>, vector<8x32xf32>,
    %c0_23 = arith.constant 0 : index
    %c0_24 = arith.constant 0 : index
    %49 = vector.load %arg7[%c0_23, %c0_24] : memref<8x32xf32, #tpu.memory_space<vmem>>, vector<8x32xf32>
    %50 = arith.addf %27, %32 : vector<8x32xf32>
    %51 = arith.addf %49, %50 : vector<8x32xf32>
    %c0_25 = arith.constant 0 : index
    %c0_26 = arith.constant 0 : index
    %52 = vector.load %arg7[%c0_25, %c0_26] : memref<8x32xf32, #tpu.memory_space<vmem>>, vector<8x32xf32>
    tpu.vector_store %arg7[%c0_25, %c0_26], %51 {strides = array<i32>} : memref<8x32xf32, #tpu.memory_space<vmem>>, vector<8x32xf32>,
    %c0_27 = arith.constant 0 : index
    %c0_28 = arith.constant 0 : index
    %53 = vector.load %arg8[%c0_27, %c0_28] : memref<8x32xf32, #tpu.memory_space<vmem>>, vector<8x32xf32>
    %54 = arith.mulf %27, %27 : vector<8x32xf32>
    %55 = arith.mulf %32, %32 : vector<8x32xf32>
    %56 = arith.addf %54, %55 : vector<8x32xf32>
    %57 = arith.addf %53, %56 : vector<8x32xf32>
    %c0_29 = arith.constant 0 : index
    %c0_30 = arith.constant 0 : index
    %58 = vector.load %arg8[%c0_29, %c0_30] : memref<8x32xf32, #tpu.memory_space<vmem>>, vector<8x32xf32>
    tpu.vector_store %arg8[%c0_29, %c0_30], %57 {strides = array<i32>} : memref<8x32xf32, #tpu.memory_space<vmem>>, vector<8x32xf32>,
    %c0_31 = arith.constant 0 : index
    %c0_32 = arith.constant 0 : index
    %59 = vector.load %arg9[%c0_31, %c0_32] : memref<8x32xf32, #tpu.memory_space<vmem>>, vector<8x32xf32>
    %60 = arith.addf %37, %42 : vector<8x32xf32>
    %61 = arith.addf %59, %60 : vector<8x32xf32>
    %c0_33 = arith.constant 0 : index
    %c0_34 = arith.constant 0 : index
    %62 = vector.load %arg9[%c0_33, %c0_34] : memref<8x32xf32, #tpu.memory_space<vmem>>, vector<8x32xf32>
    tpu.vector_store %arg9[%c0_33, %c0_34], %61 {strides = array<i32>} : memref<8x32xf32, #tpu.memory_space<vmem>>, vector<8x32xf32>,
    %c0_35 = arith.constant 0 : index
    %c0_36 = arith.constant 0 : index
    %63 = vector.load %arg10[%c0_35, %c0_36] : memref<8x32xf32, #tpu.memory_space<vmem>>, vector<8x32xf32>
    %64 = arith.mulf %37, %37 : vector<8x32xf32>
    %65 = arith.mulf %42, %42 : vector<8x32xf32>
    %66 = arith.addf %64, %65 : vector<8x32xf32>
    %67 = arith.addf %63, %66 : vector<8x32xf32>
    %c0_37 = arith.constant 0 : index
    %c0_38 = arith.constant 0 : index
    %68 = vector.load %arg10[%c0_37, %c0_38] : memref<8x32xf32, #tpu.memory_space<vmem>>, vector<8x32xf32>
    tpu.vector_store %arg10[%c0_37, %c0_38], %67 {strides = array<i32>} : memref<8x32xf32, #tpu.memory_space<vmem>>, vector<8x32xf32>,
    return
  }
  func.func @transform_0(%arg0: i32, %arg1: i32) -> (i32, i32, i32) {
    %c1_i32 = arith.constant 1 : i32
    %0 = arith.muli %arg0, %c1_i32 : i32
    %1 = arith.addi %0, %arg1 : i32
    %c0_i32 = arith.constant 0 : i32
    %2 = arith.minsi %1, %c0_i32 : i32
    %c0_i32_0 = arith.constant 0 : i32
    %c0_i32_1 = arith.constant 0 : i32
    %c0_i32_2 = arith.constant 0 : i32
    return %c0_i32_0, %2, %c0_i32_1 : i32, i32, i32
  }
  func.func @transform_1(%arg0: i32, %arg1: i32) -> (i32, i32, i32) {
    %c1_i32 = arith.constant 1 : i32
    %0 = arith.muli %arg0, %c1_i32 : i32
    %1 = arith.addi %0, %arg1 : i32
    %c0_i32 = arith.constant 0 : i32
    %2 = arith.minsi %1, %c0_i32 : i32
    %c1_i32_0 = arith.constant 1 : i32
    %c0_i32_1 = arith.constant 0 : i32
    %c0_i32_2 = arith.constant 0 : i32
    return %c1_i32_0, %2, %c0_i32_1 : i32, i32, i32
  }
  func.func @transform_2(%arg0: i32, %arg1: i32) -> (i32, i32, i32) {
    %c1_i32 = arith.constant 1 : i32
    %0 = arith.muli %arg0, %c1_i32 : i32
    %1 = arith.addi %0, %arg1 : i32
    %c0_i32 = arith.constant 0 : i32
    %2 = arith.minsi %1, %c0_i32 : i32
    %c0_i32_0 = arith.constant 0 : i32
    %c0_i32_1 = arith.constant 0 : i32
    %c0_i32_2 = arith.constant 0 : i32
    return %c0_i32_0, %2, %c0_i32_1 : i32, i32, i32
  }
  func.func @transform_3(%arg0: i32, %arg1: i32) -> (i32, i32, i32) {
    %c1_i32 = arith.constant 1 : i32
    %0 = arith.muli %arg0, %c1_i32 : i32
    %1 = arith.addi %0, %arg1 : i32
    %c0_i32 = arith.constant 0 : i32
    %2 = arith.minsi %1, %c0_i32 : i32
    %c1_i32_0 = arith.constant 1 : i32
    %c0_i32_1 = arith.constant 0 : i32
    %c0_i32_2 = arith.constant 0 : i32
    return %c1_i32_0, %2, %c0_i32_1 : i32, i32, i32
  }
  func.func @transform_4(%arg0: i32, %arg1: i32) -> (i32, i32) {
    %c0_i32 = arith.constant 0 : i32
    %c0_i32_0 = arith.constant 0 : i32
    return %arg0, %c0_i32 : i32, i32
  }
  func.func @transform_5(%arg0: i32, %arg1: i32) -> (i32, i32) {
    %c0_i32 = arith.constant 0 : i32
    %c0_i32_0 = arith.constant 0 : i32
    return %arg0, %c0_i32 : i32, i32
  }
  func.func @transform_6(%arg0: i32, %arg1: i32) -> (i32, i32) {
    %c0_i32 = arith.constant 0 : i32
    %c0_i32_0 = arith.constant 0 : i32
    return %arg0, %c0_i32 : i32, i32
  }
  func.func @transform_7(%arg0: i32, %arg1: i32) -> (i32, i32) {
    %c0_i32 = arith.constant 0 : i32
    %c0_i32_0 = arith.constant 0 : i32
    return %arg0, %c0_i32 : i32, i32
  }
  func.func @transform_8(%arg0: i32, %arg1: i32) -> (i32, i32) {
    %c0_i32 = arith.constant 0 : i32
    %c0_i32_0 = arith.constant 0 : i32
    return %arg0, %c0_i32 : i32, i32
  }
}

</mosaic_0001>

<bundles_post_ra>
// kernel: byol_loss.1
= control target key start
LH: loop header
LB: loop body
LE: loop exit
PB: predicated region body
PF: predicated region fallthrough
CT: control target
= control target key end

     0   :  { %14 = vsyncpa [#allocation3], 0  ;;  %s505_s0 = inlined_call_operand.hbm [shape: f32[2,8,32], index: 0, kind: input, shape index: {}, may-alias: {0,1}]   ;;  %s506_s1 = inlined_call_operand.hbm [shape: f32[2,8,32], index: 1, kind: input, shape index: {}, may-alias: {0,1}]   ;;  %s507_s2 = inlined_call_operand.hbm [shape: f32[2,8,32], index: 2, kind: input, shape index: {}, may-alias: {2,3}]   ;;  %s508_s3 = inlined_call_operand.hbm [shape: f32[2,8,32], index: 3, kind: input, shape index: {}, may-alias: {2,3}]   ;;  %s509_s4 = inlined_call_operand.vmem [shape: f32[8,32], index: 4, kind: output, shape index: {0}]   ;;  %s510_s5 = inlined_call_operand.vmem [shape: f32[8,32], index: 5, kind: output, shape index: {1}]   ;;  %s511_s6 = inlined_call_operand.vmem [shape: f32[8,32], index: 6, kind: output, shape index: {2}]   ;;  %s512_s7 = inlined_call_operand.vmem [shape: f32[8,32], index: 7, kind: output, shape index: {3}]   ;;  %s513_s8 = inlined_call_operand.vmem [shape: f32[8,32], index: 8, kind: output, shape index: {4}]  }
   0x1   :  { %15 = vsyncpa [#allocation5], 0  ;;  %s243_s29 = scalar_lea.hbm %s506_s1, 8 }
   0x2   :  { %16 = vsyncpa [#allocation8], 0  ;;  %s44_s30 = sshll.u32 %s243_s29, 4  ;;  %s364_s9 = smov [#allocation4]   ;;  %s45_s30 = int_to_ptr.hbm [resolvable:$true] %s44_s30 }
   0x3   :  { %s46_s10 = sshll.u32 %s364_s9, 4  ;;  %s27_s13 = sshll.u32 %s505_s0, 4  ;;  %s47_s10 = int_to_ptr.vmem [resolvable:$true] %s46_s10  ;;  %s28_s13 = int_to_ptr.hbm [resolvable:$true] %s27_s13 }
   0x4   :  { %49 = dma.hbm_to_vmem [thread:$0]  %s45_s30, 128, %s47_s10, [#allocation5]  }
   0x5   :  { %s365_s14 = smov [#allocation2]   ;;  %s60_s18 = sshll.u32 %s507_s2, 4  ;;  %s61_s18 = int_to_ptr.hbm [resolvable:$true] %s60_s18 }
   0x6   :  { %s29_s15 = sshll.u32 %s365_s14, 4  ;;  %s366_s1 = smov [#allocation6]   ;;  %s30_s15 = int_to_ptr.vmem [resolvable:$true] %s29_s15 }
   0x7   :  { %32 = dma.hbm_to_vmem [thread:$0]  %s28_s13, 128, %s30_s15, [#allocation3]  }
   0x8   :  { %s62_s19 = sshll.u32 %s366_s1, 4  ;;  %s248_s22 = scalar_lea.hbm %s508_s3, 8  ;;  %s63_s19 = int_to_ptr.vmem [resolvable:$true] %s62_s19 }
   0x9   :  { %s77_s23 = sshll.u32 %s248_s22, 4  ;;  %s367_s0 = smov [#allocation7]   ;;  %s78_s23 = int_to_ptr.hbm [resolvable:$true] %s77_s23 }
   0xa   :  { %65 = dma.hbm_to_vmem [thread:$0]  %s61_s18, 128, %s63_s19, [#allocation5]  }
   0xb   :  { %s79_s24 = sshll.u32 %s367_s0, 4  ;;  %s80_s24 = int_to_ptr.vmem [resolvable:$true] %s79_s24 }
   0xc   :  { %82 = dma.hbm_to_vmem [thread:$0]  %s78_s23, 128, %s80_s24, [#allocation8]  }
   0xd   :  { %358 = dma.done.wait [#allocation3], 128  }
   0xe   :  { %359 = vsyncadd [#allocation3], 4294967168 }
   0xf   :  { %360 = dma.done.wait [#allocation5], 256  }
  0x10   :  { %361 = vsyncadd [#allocation5], 4294967040 }
  0x11   :  { %362 = dma.done.wait [#allocation8], 128  }
  0x12   :  { %363 = vsyncadd [#allocation8], 4294967168  ;;  %vm115_vm0 = vcmask 261120   ;;  %v426_v0 = vld [vmem:[#allocation6] sm:$0xff]  ;;  %v428_v1 = vld [vmem:[#allocation2] sm:$0xff]  ;;  %v368_v12 = vmov 0.0  }
  0x13   :  { %v134_v2 = vmul.f32 %v426_v0, %v426_v0  ;;  %v125_v3 = vmul.f32 %v428_v1, %v428_v1  ;;  %v434_v4 = vld [vmem:[#allocation7] sm:$0xff]  ;;  %v436_v5 = vld [vmem:[#allocation4] sm:$0xff]  ;;  %119 = vst.msk [vmem:[%s512_s7] sm:$0xff] %vm115_vm0, %v368_v12 }
  0x14   :  { %v138_v8 = vmul.f32 %v434_v4, %v434_v4  ;;  %v130_v9 = vmul.f32 %v436_v5, %v436_v5  ;;  %120 = vst.msk [vmem:[%s513_s8] sm:$0xff] %vm115_vm0, %v368_v12 }
  0x15   :  { %v135_v6 = vsel %vm115_vm0, %v134_v2, 0.0  ;;  %v127_v7 = vsel %vm115_vm0, %v125_v3, 0.0  ;;  %116 = vst.msk [vmem:[%s509_s4] sm:$0xff] %vm115_vm0, %v368_v12 }
  0x16   :  { %136 = vadd.xlane.f32.xlu1 %v135_v6  ;;  %128 = vadd.xlane.f32.xlu0 %v127_v7  ;;  %v139_v10 = vsel %vm115_vm0, %v138_v8, 0.0  ;;  %v131_v11 = vsel %vm115_vm0, %v130_v9, 0.0  ;;  %117 = vst.msk [vmem:[%s510_s5] sm:$0xff] %vm115_vm0, %v368_v12 }
  0x17   :  { %118 = vst.msk [vmem:[%s511_s6] sm:$0xff] %vm115_vm0, %v368_v12 }
  0x1a   :  { %v206_v52 = vld [vmem:[%s512_s7] sm:$0xff] }
  0x1b   :  { %v210_v60 = vld [vmem:[%s513_s8] sm:$0xff] }
  0x1c   :  { %v193_v2 = vld [vmem:[%s509_s4] sm:$0xff] }
  0x1d   :  { %v196_v58 = vld [vmem:[%s510_s5] sm:$0xff] }
  0x1e   :  { %140 = vadd.xlane.f32.xlu1 %v139_v10  ;;  %132 = vadd.xlane.f32.xlu0 %v131_v11  ;;  %v200_v3 = vld [vmem:[%s511_s6] sm:$0xff] }
  0x89   :  { %v137_v13 = vpop.xlane.xlu1 %136  ;;  %v129_v14 = vpop.xlane.xlu0 %128 }
  0x8a   :  { %v166_v15 = vmax.f32 %v137_v13, 1e-24  ;;  %v142_v16 = vmax.f32 %v129_v14, 1e-24 }
  0x8c   :  { %254 = vrsqrt.f32 %v166_v15  ;;  %vm173_vm3 = vweird.f32 %v166_v15  ;;  %vm149_vm5 = vweird.f32 %v142_v16 }
  0x8d   :  { %256 = vrsqrt.f32 %v142_v16 }
  0x91   :  { %v141_v17 = vpop.xlane.xlu1 %140  ;;  %v133_v18 = vpop.xlane.xlu0 %132 }
  0x92   :  { %v255_v19 = vpop.eup %254  ;;  %v178_v20 = vmax.f32 %v141_v17, 1e-24  ;;  %v154_v21 = vmax.f32 %v133_v18, 1e-24 }
  0x93   :  { %v257_v22 = vpop.eup %256  ;;  %v168_v23 = vmul.f32 %v255_v19, %v166_v15  ;;  %vm174_vm1 = vweird.f32 %v255_v19 }
  0x94   :  { %v144_v24 = vmul.f32 %v257_v22, %v142_v16  ;;  %258 = vrsqrt.f32 %v178_v20  ;;  %vm150_vm2 = vweird.f32 %v257_v22  ;;  %vm175_vm4 = vmor %vm173_vm3, %vm174_vm1  ;;  %vm185_vm9 = vweird.f32 %v178_v20 }
  0x95   :  { %v169_v25 = vmul.f32 %v255_v19, %v168_v23  ;;  %260 = vrsqrt.f32 %v154_v21  ;;  %vm151_vm6 = vmor %vm149_vm5, %vm150_vm2  ;;  %vm161_vm11 = vweird.f32 %v154_v21 }
  0x96   :  { %v145_v26 = vmul.f32 %v257_v22, %v144_v24 }
  0x97   :  { %v170_v27 = vmul.f32 0.5, %v169_v25 }
  0x98   :  { %v146_v28 = vmul.f32 0.5, %v145_v26 }
  0x99   :  { %v171_v29 = vsub.f32 1.5, %v170_v27 }
  0x9a   :  { %v259_v30 = vpop.eup %258  ;;  %v147_v31 = vsub.f32 1.5, %v146_v28 }
  0x9b   :  { %v261_v32 = vpop.eup %260  ;;  %v180_v33 = vmul.f32 %v259_v30, %v178_v20  ;;  %v172_v35 = vmul.f32 %v255_v19, %v171_v29  ;;  %vm186_vm7 = vweird.f32 %v259_v30 }
  0x9c   :  { %v156_v34 = vmul.f32 %v261_v32, %v154_v21  ;;  %v148_v37 = vmul.f32 %v257_v22, %v147_v31  ;;  %vm162_vm8 = vweird.f32 %v261_v32  ;;  %vm187_vm10 = vmor %vm185_vm9, %vm186_vm7 }
  0x9d   :  { %v181_v36 = vmul.f32 %v259_v30, %v180_v33  ;;  %v176_v41 = vsel %vm175_vm4, %v255_v19, %v172_v35  ;;  %vm163_vm12 = vmor %vm161_vm11, %vm162_vm8 }
  0x9e   :  { %v157_v38 = vmul.f32 %v261_v32, %v156_v34  ;;  %v152_v43 = vsel %vm151_vm6, %v257_v22, %v148_v37  ;;  %v177_v46 = vmul.f32 %v176_v41, %v426_v0 }
  0x9f   :  { %v182_v39 = vmul.f32 0.5, %v181_v36  ;;  %v153_v48 = vmul.f32 %v152_v43, %v428_v1 }
  0xa0   :  { %v158_v40 = vmul.f32 0.5, %v157_v38  ;;  %v211_v54 = vmul.f32 %v177_v46, %v177_v46 }
  0xa1   :  { %v183_v42 = vsub.f32 1.5, %v182_v39  ;;  %v201_v59 = vmul.f32 %v153_v48, %v153_v48 }
  0xa2   :  { %v159_v44 = vsub.f32 1.5, %v158_v40 }
  0xa3   :  { %v184_v45 = vmul.f32 %v259_v30, %v183_v42 }
  0xa4   :  { %v160_v47 = vmul.f32 %v261_v32, %v159_v44 }
  0xa5   :  { %v188_v49 = vsel %vm187_vm10, %v259_v30, %v184_v45 }
  0xa6   :  { %v189_v50 = vmul.f32 %v188_v49, %v434_v4  ;;  %v164_v51 = vsel %vm163_vm12, %v261_v32, %v160_v47 }
  0xa7   :  { %v165_v53 = vmul.f32 %v164_v51, %v436_v5 }
  0xa8   :  { %v191_v55 = vmul.f32 %v189_v50, %v153_v48  ;;  %v207_v56 = vadd.f32 %v189_v50, %v177_v46  ;;  %v212_v57 = vmul.f32 %v189_v50, %v189_v50 }
  0xa9   :  { %v190_v61 = vmul.f32 %v177_v46, %v165_v53  ;;  %v197_v62 = vadd.f32 %v165_v53, %v153_v48  ;;  %v202_v63 = vmul.f32 %v165_v53, %v165_v53 }
  0xaa   :  { %v208_v0 = vadd.f32 %v207_v56, %v206_v52  ;;  %v213_v1 = vadd.f32 %v212_v57, %v211_v54 }
  0xab   :  { %v192_v4 = vadd.f32 %v191_v55, %v190_v61  ;;  %v198_v5 = vadd.f32 %v197_v62, %v196_v58  ;;  %v203_v6 = vadd.f32 %v202_v63, %v201_v59 }
  0xac   :  { %209 = vst.msk [vmem:[%s512_s7] sm:$0xff] %vm115_vm0, %v208_v0  ;;  %v214_v7 = vadd.f32 %v213_v1, %v210_v60 }
  0xad   :  { %v194_v8 = vadd.f32 %v193_v2, %v192_v4  ;;  %199 = vst.msk [vmem:[%s510_s5] sm:$0xff] %vm115_vm0, %v198_v5  ;;  %v204_v9 = vadd.f32 %v203_v6, %v200_v3 }
  0xae   :  { %215 = vst.msk [vmem:[%s513_s8] sm:$0xff] %vm115_vm0, %v214_v7 }
  0xaf   :  { %195 = vst.msk [vmem:[%s509_s4] sm:$0xff] %vm115_vm0, %v194_v8 }
  0xb0   :  { %205 = vst.msk [vmem:[%s511_s6] sm:$0xff] %vm115_vm0, %v204_v9 }
  0xb1   :  { %236 = vsyncpa [#allocation3], 1 }
  0xb2   :  { %237 = vsyncpa [#allocation5], 1 }
  0xb3   :  { %238 = vsyncpa [#allocation8], 1 }

</bundles_post_ra>
